<compile_context>
chip_gen: v7x
topology: tpu7x:2x2x1
jax: 0.10.0
libtpu: 0.0.40
codegen_flags: <defaults>
</compile_context>

<pallas_src>
import functools

import jax
import jax.numpy as jnp
from jax.experimental import pallas as pl
from jax.experimental.pallas import tpu as pltpu

BN_EPS = 1e-5


# ----------------------------------------------------------------------------
# Plain-JAX glue: sampling / grouping (data-dependent gathers)
# ----------------------------------------------------------------------------
def farthest_point_sample(xyz, npoint):
    """xyz: (B, N, 3) -> (B, npoint) int32 indices.

    TODO(synk): PyTorch seeds `farthest` with torch.randint; we seed with index
    0 per batch so the script is deterministic (indices differ run-for-run vs torch).
    """
    B, N, _ = xyz.shape

    def body(i, state):
        centroids, distance, farthest = state
        centroids = centroids.at[:, i].set(farthest)
        gather_idx = jnp.broadcast_to(farthest[:, None, None], (B, 1, 3))
        centroid = jnp.take_along_axis(xyz, gather_idx, axis=1)              # (B,1,3)
        dist = jnp.sum((xyz - centroid) ** 2, axis=-1)                       # (B,N)
        distance = jnp.minimum(distance, dist)
        farthest = jnp.argmax(distance, axis=-1).astype(jnp.int32)
        return centroids, distance, farthest

    centroids = jnp.zeros((B, npoint), dtype=jnp.int32)
    distance = jnp.full((B, N), 1e10, dtype=jnp.float32)
    farthest = jnp.zeros((B,), dtype=jnp.int32)
    centroids, _, _ = jax.lax.fori_loop(0, npoint, body, (centroids, distance, farthest))
    return centroids


def index_points(points, idx):
    """points: (B, N, C); idx: (B, S) or (B, S, K)."""
    C = points.shape[-1]
    if idx.ndim == 2:
        gidx = jnp.broadcast_to(idx[:, :, None], idx.shape + (C,))
        return jnp.take_along_axis(points, gidx, axis=1)
    B, S, K = idx.shape
    flat = idx.reshape(B, S * K)
    gidx = jnp.broadcast_to(flat[:, :, None], (B, S * K, C))
    g = jnp.take_along_axis(points, gidx, axis=1)
    return g.reshape(B, S, K, C)


def query_ball_point(radius, nsample, xyz, new_xyz):
    """xyz: (B, N, 3); new_xyz: (B, S, 3) -> (B, S, nsample) int32 indices."""
    B, N, _ = xyz.shape
    S = new_xyz.shape[1]
    sqrdists = jnp.sum((new_xyz[:, :, None, :] - xyz[:, None, :, :]) ** 2, axis=-1)
    group_idx = jnp.broadcast_to(jnp.arange(N, dtype=jnp.int32), (B, S, N))
    group_idx = jnp.where(sqrdists > radius ** 2, N, group_idx)
    group_idx = jnp.sort(group_idx, axis=-1)[:, :, :nsample]
    group_first = jnp.broadcast_to(group_idx[:, :, :1], (B, S, nsample))
    group_idx = jnp.where(group_idx == N, group_first, group_idx)
    return group_idx.astype(jnp.int32)


# ----------------------------------------------------------------------------
# Tiling / VMEM planning
# ----------------------------------------------------------------------------
def _round_up(x, m):
    return ((x + m - 1) // m) * m


def _vmem_limit_bytes():
    """Per-generation scoped-VMEM limit (96 MiB on 128-MiB parts, 40 MiB on v7x)."""
    cap = 0
    try:
        info = pltpu.get_tpu_info()
        cap = int(getattr(info, "vmem_capacity_bytes", 0) or 0)
    except Exception:
        cap = 0
    if cap <= 0:
        cap = 64 << 20                      # conservative (v7x-sized) fallback
    if cap >= (128 << 20):
        return 96 << 20                     # v5e / v6e: headroom for big tiles
    return 40 << 20                         # v7x: 64 MiB physical; stay well under


def _plan_tiles(total_groups, nsample, layer_dims, vmem_limit):
    """Per-layer tile sizes (in groups), megacore split, padded group count.

    All tile sizes are base_tg * 2^k (a divisibility chain), so one padded
    group count works for every layer. base_tg is the smallest group count
    whose row tile is a multiple of 8 sublanes.
    """
    base_tg = 1
    while (base_tg * nsample) % 8:
        base_tg += 1                        # always a power of two (8/gcd(nsample,8))

    nc = 2                                  # leading "parallel" axis -> both TCs on v7x
    budget = vmem_limit // 3                # streamed, double-buffered blocks
    target_bytes = 2 << 20                  # aim >= ~2 MiB input DMA per grid step
    groups_cap = max(_round_up(total_groups, base_tg), base_tg)

    layer_tgs = []
    for cin, cout in layer_dims:
        per_row = 2 * 2 * (cin + cout)      # bf16 in + out, double buffered
        max_rows = max(budget // per_row, base_tg * nsample)
        want_rows = max(target_bytes // (2 * max(cin, 1)), 4096)
        rows = min(max_rows, want_rows)
        tg = base_tg
        while (tg * 2 * nsample <= rows) and (tg * 2 * nc <= groups_cap):
            tg *= 2
        layer_tgs.append(tg)

    max_tg = max(layer_tgs)
    pad_unit = max(nc * max_tg, 8)          # pool output tiles need >= 8 groups
    total_groups_pad = _round_up(total_groups, pad_unit)

    # Max-pool tile (in groups): power of two, multiple of 8, divides pad_unit.
    c_last = layer_dims[-1][1]
    per_group = 2 * (2 * nsample * c_last + 4 * c_last)
    max_g = max(budget // per_group, 8)
    want_g = max(target_bytes // (2 * nsample * c_last), 8)
    g = min(max_g, want_g, pad_unit, total_groups_pad)
    pool_tg = 8
    while pool_tg * 2 <= g:
        pool_tg *= 2
    return nc, total_groups_pad, layer_tgs, pool_tg


# ----------------------------------------------------------------------------
# Pallas kernel 1: (prev-BN shift + ReLU) -> 1x1-conv matmul -> BN-stat accumulate
# ----------------------------------------------------------------------------
def _matmul_stats_kernel(apply_prev_bn, tiles_per_core, tile_rows, mask_rows,
                         x_ref, w_ref, shift_ref, z_ref, sum_ref, ssq_ref):
    """x_ref: (tile_rows, Cin) bf16; w_ref: (Cin, Cout) bf16 (prev-BN scale folded);
    shift_ref: (1, Cin) f32; z_ref: (tile_rows, Cout) bf16;
    sum_ref/ssq_ref: (1, 8, Cout) f32 per-core accumulators."""
    if apply_prev_bn:
        # Previous layer's folded BN shift + ReLU (scale already folded into W).
        h = jnp.maximum(x_ref[...].astype(jnp.float32) + shift_ref[...], 0.0)
        h = h.astype(jnp.bfloat16)
    else:
        h = x_ref[...]

    # 1x1 conv == per-row matmul: bf16 operands on the MXU, f32 accumulation.
    # Conv bias is intentionally omitted (exactly cancelled by BN mean-subtract).
    z = jnp.dot(h, w_ref[...], preferred_element_type=jnp.float32)
    z_ref[...] = z.astype(z_ref.dtype)

    @pl.when(pl.program_id(1) == 0)
    def _():
        sum_ref[...] = jnp.zeros_like(sum_ref)
        ssq_ref[...] = jnp.zeros_like(ssq_ref)

    if mask_rows is not None:
        # Mask padded rows out of the BatchNorm statistics.
        row0 = (pl.program_id(0) * tiles_per_core + pl.program_id(1)) * tile_rows
        rows = jax.lax.broadcasted_iota(jnp.int32, z.shape, 0) + row0
        zm = jnp.where(rows < mask_rows, z, 0.0)
    else:
        zm = z

    # Per-core, grid-resident f32 accumulators (revisited along the "arbitrary"
    # axis). The (1, cout) column sums broadcast over the 8 sublane rows; the
    # host reads row 0 of each core block.
    sum_ref[...] += jnp.sum(zm, axis=0, keepdims=True)
    ssq_ref[...] += jnp.sum(zm * zm, axis=0, keepdims=True)


def _matmul_stats_call(h, w_bf16, shift, apply_prev_bn, tile_rows, nc,
                       tiles_per_core, m_valid, vmem_limit):
    m_pad, cin = h.shape
    cout = w_bf16.shape[1]
    mask_rows = m_valid if m_valid != m_pad else None
    kernel = functools.partial(_matmul_stats_kernel, apply_prev_bn,
                               tiles_per_core, tile_rows, mask_rows)
    row_map = lambda c, i: (c * tiles_per_core + i, 0)
    acc_map = lambda c, i: (c, 0, 0)
    bytes_accessed = (m_pad * cin * 2            # activations in (bf16)
                      + cin * cout * 2           # resident weight (bf16)
                      + m_pad * cout * 2         # z out (bf16)
                      + cin * 4                  # shift
                      + 2 * nc * 8 * cout * 4)   # sum / ssq
    return pl.pallas_call(
        kernel,
        grid_spec=pltpu.PrefetchScalarGridSpec(
            num_scalar_prefetch=0,
            grid=(nc, tiles_per_core),
            in_specs=[
                pl.BlockSpec((tile_rows, cin), row_map),
                pl.BlockSpec((cin, cout), lambda c, i: (0, 0)),
                pl.BlockSpec((1, cin), lambda c, i: (0, 0)),
            ],
            out_specs=[
                pl.BlockSpec((tile_rows, cout), row_map),
                pl.BlockSpec((1, 8, cout), acc_map),
                pl.BlockSpec((1, 8, cout), acc_map),
            ],
        ),
        out_shape=(
            jax.ShapeDtypeStruct((m_pad, cout), jnp.bfloat16),   # pre-activation (HBM)
            jax.ShapeDtypeStruct((nc, 8, cout), jnp.float32),    # per-core sum(z)
            jax.ShapeDtypeStruct((nc, 8, cout), jnp.float32),    # per-core sum(z*z)
        ),
        compiler_params=pltpu.CompilerParams(
            # Leading axis "parallel" -> sharded across both TensorCores on v7x;
            # trailing axis "arbitrary" -> BN-stat accumulator stays resident.
            dimension_semantics=("parallel", "arbitrary"),
            vmem_limit_bytes=vmem_limit),
        cost_estimate=pl.CostEstimate(
            flops=int(2 * m_pad * cin * cout),
            transcendentals=0,
            bytes_accessed=int(bytes_accessed)),
    )(h, w_bf16, shift)


# ----------------------------------------------------------------------------
# Pallas kernel 2: fused per-group max-pool + folded BN + ReLU
# ----------------------------------------------------------------------------
def _bn_relu_maxpool_kernel(z_ref, scale_ref, shift_ref, o_ref):
    """z_ref: (tg, nsample, C) bf16; scale/shift: (1, C) f32; o_ref: (tg, C) f32.

    scale > 0 (gamma is its init value 1), so the per-channel affine and ReLU
    both commute with the max over the nsample axis -> apply them post-pool.
    """
    pooled = jnp.max(z_ref[...].astype(jnp.float32), axis=1)          # (tg, C)
    o_ref[...] = jnp.maximum(pooled * scale_ref[...] + shift_ref[...], 0.0)


def _bn_relu_maxpool_call(z3, scale, shift, tile_groups, vmem_limit):
    gp, nsample, c = z3.shape
    num_tiles = gp // tile_groups
    bytes_accessed = gp * nsample * c * 2 + gp * c * 4 + 2 * c * 4
    return pl.pallas_call(
        _bn_relu_maxpool_kernel,
        grid_spec=pltpu.PrefetchScalarGridSpec(
            num_scalar_prefetch=0,
            grid=(num_tiles,),
            in_specs=[
                pl.BlockSpec((tile_groups, nsample, c), lambda i: (i, 0, 0)),
                pl.BlockSpec((1, c), lambda i: (0, 0)),
                pl.BlockSpec((1, c), lambda i: (0, 0)),
            ],
            out_specs=pl.BlockSpec((tile_groups, c), lambda i: (i, 0)),
        ),
        out_shape=jax.ShapeDtypeStruct((gp, c), jnp.float32),
        compiler_params=pltpu.CompilerParams(
            dimension_semantics=("parallel",),   # independent tiles -> megacore on v7x
            vmem_limit_bytes=vmem_limit),
        cost_estimate=pl.CostEstimate(
            flops=int(gp * nsample * c + 3 * gp * c),
            transcendentals=0,
            bytes_accessed=int(bytes_accessed)),
    )(z3, scale, shift)


# ----------------------------------------------------------------------------
# Host-side orchestration of the fused MLP
# ----------------------------------------------------------------------------
def sa_mlp_pallas(x_flat, layer_params, total_groups, nsample):
    """x_flat: (total_groups*nsample, C0) f32; layer_params: list of (W, gamma, beta)."""
    m, c0 = x_flat.shape
    assert m == total_groups * nsample
    vmem_limit = _vmem_limit_bytes()

    # Pad layer-0 contraction dim (in_channel+3, typically 6-9) to 8 sublanes.
    c0p = _round_up(c0, 8)
    layer_dims = []
    cin = c0p
    for (w, _, _) in layer_params:
        layer_dims.append((cin, w.shape[1]))
        cin = w.shape[1]

    nc, total_groups_pad, layer_tgs, pool_tg = _plan_tiles(
        total_groups, nsample, layer_dims, vmem_limit)
    m_pad = total_groups_pad * nsample

    # bf16 layer-0 input (the MXU consumes bf16 anyway): halves layer-0 read
    # bytes. Padded rows are masked out of the BN statistics in-kernel.
    h = jnp.pad(x_flat.astype(jnp.bfloat16), ((0, m_pad - m), (0, c0p - c0)))

    prev_scale = None
    prev_shift = None
    for layer_idx, (w, gamma, beta) in enumerate(layer_params):
        cin_l, cout_l = layer_dims[layer_idx]
        if layer_idx == 0:
            w_eff = jnp.pad(w, ((0, c0p - c0), (0, 0))) if c0p != c0 else w
            shift = jnp.zeros((1, cin_l), jnp.float32)
            apply_prev_bn = False
        else:
            # Fold previous layer's BN scale into this layer's weights:
            # relu(s*h + t) = s * relu(h + t/s) for s > 0 (gamma is 1 here).
            w_eff = prev_scale.reshape(-1, 1) * w
            shift = (prev_shift / prev_scale).reshape(1, -1)
            apply_prev_bn = True

        tg = layer_tgs[layer_idx]
        tile_rows = tg * nsample
        tiles_per_core = total_groups_pad // (nc * tg)
        z, psum, pssq = _matmul_stats_call(
            h, w_eff.astype(jnp.bfloat16), shift, apply_prev_bn,
            tile_rows, nc, tiles_per_core, m, vmem_limit)

        # Finalize exact (biased) batch statistics == BatchNorm2d training mode,
        # then fold gamma/beta/mean/var into one scale/shift (applied downstream).
        zsum = psum[:, 0, :].sum(axis=0)
        zssq = pssq[:, 0, :].sum(axis=0)
        mean = zsum / m
        # TODO(synk): E[z^2]-E[z]^2 in f32 can lose precision for very large M /
        # low-variance channels; switch to per-tile centered sums if that bites.
        var = jnp.maximum(zssq / m - mean * mean, 0.0)
        prev_scale = gamma.reshape(-1) * jax.lax.rsqrt(var + BN_EPS)
        prev_shift = beta.reshape(-1) - mean * prev_scale

        h = z                      # bf16 pre-activations stay in HBM for the next pass

    # Last layer: fused max-pool + folded BN + ReLU; padded groups sliced off.
    c_last = h.shape[-1]
    z3 = h.reshape(total_groups_pad, nsample, c_last)     # HBM view reshape (free)
    pooled = _bn_relu_maxpool_call(
        z3, prev_scale.reshape(1, -1), prev_shift.reshape(1, -1),
        pool_tg, vmem_limit)
    return pooled[:total_groups]


# ----------------------------------------------------------------------------
# Module wrapper
# ----------------------------------------------------------------------------
class PointNetSetAbstractionPallas:
    def __init__(self, npoint, radius, nsample, in_channel, mlp, key):
        self.npoint = npoint
        self.radius = radius
        self.nsample = nsample
        self.layer_params = []
        last_channel = in_channel + 3
        for out_channel in mlp:
            key, kw = jax.random.split(key)
            # Conv2d(last, out, 1) weight (out, last, 1, 1) -> stored as (last, out).
            # No conv bias: under training-mode BatchNorm it is exactly cancelled.
            w = (jax.random.normal(kw, (last_channel, out_channel), jnp.float32)
                 * (1.0 / float(last_channel) ** 0.5))
            gamma = jnp.ones((1, out_channel), jnp.float32)   # BatchNorm2d init
            beta = jnp.zeros((1, out_channel), jnp.float32)
            self.layer_params.append((w, gamma, beta))
            last_channel = out_channel

    def __call__(self, xyz, points):
        """xyz: (B, N, 3); points: (B, N, C) or None."""
        B, N, _ = xyz.shape
        idx = farthest_point_sample(xyz, self.npoint)                    # (B, S)
        new_xyz = index_points(xyz, idx)                                 # (B, S, 3)
        group_idx = query_ball_point(self.radius, self.nsample, xyz, new_xyz)
        grouped_xyz = index_points(xyz, group_idx)                       # (B, S, K, 3)
        grouped_xyz = grouped_xyz - new_xyz[:, :, None, :]
        if points is not None:
            grouped_points = index_points(points, group_idx)             # (B, S, K, C)
            grouped_points = jnp.concatenate([grouped_xyz, grouped_points], axis=-1)
        else:
            grouped_points = grouped_xyz

        Bq, S, K, C0 = grouped_points.shape
        x_flat = grouped_points.reshape(Bq * S * K, C0).astype(jnp.float32)
        pooled = sa_mlp_pallas(x_flat, self.layer_params, Bq * S, K)     # (B*S, C_last)
        new_points = pooled.reshape(Bq, S, -1)                           # (B, S, C_last)
        return new_xyz, new_points


# ----------------------------------------------------------------------------
if __name__ == "__main__":
    key = jax.random.PRNGKey(0)
    k_xyz, k_pts, k_w = jax.random.split(key, 3)

    B, N, C_feat = 2, 32, 3
    # npoint=6 makes B*npoint=12 groups -> exercises the group-padding + BN row
    # masking path and the (2, tiles_per_core) accumulation grid at a tiny size.
    npoint, radius, nsample = 6, 0.5, 8
    mlp = [16, 32]

    xyz = jax.random.uniform(k_xyz, (B, N, 3), dtype=jnp.float32)
    points = jax.random.normal(k_pts, (B, N, C_feat), dtype=jnp.float32)

    module = PointNetSetAbstractionPallas(npoint, radius, nsample, C_feat, mlp, k_w)
    new_xyz, new_points = module(xyz, points)
    jax.block_until_ready((new_xyz, new_points))

    assert new_xyz.shape == (B, npoint, 3), new_xyz.shape
    assert new_points.shape == (B, npoint, mlp[-1]), new_points.shape
    assert bool(jnp.all(jnp.isfinite(new_points)))
    print("KERNEL_OK")
</pallas_src>

<mosaic_0001>
module attributes {stable_mosaic.version = 11 : i64} {
  func.func @_matmul_stats_kernel(%arg0: i32, %arg1: i32, %arg2: memref<32x8xbf16, #tpu.memory_space<vmem>>, %arg3: memref<8x16xbf16, #tpu.memory_space<vmem>>, %arg4: memref<1x8xf32, #tpu.memory_space<vmem>>, %arg5: memref<32x16xbf16, #tpu.memory_space<vmem>>, %arg6: memref<1x8x16xf32, #tpu.memory_space<vmem>>, %arg7: memref<1x8x16xf32, #tpu.memory_space<vmem>>) attributes {dimension_semantics = [#tpu.dimension_semantics<parallel>, #tpu.dimension_semantics<arbitrary>], iteration_bounds = array<i64: 2, 2>, scalar_prefetch = 0 : i64, scratch_operands = 0 : i64, tpu.core_type = #tpu.core_type<tc>, window_params = [{transform_indices = @transform_0, window_bounds = array<i64: 32, 8>}, {pipeline_mode = #tpu.pipeline_mode<synchronous>, transform_indices = @transform_1, window_bounds = array<i64: 8, 16>}, {pipeline_mode = #tpu.pipeline_mode<synchronous>, transform_indices = @transform_2, window_bounds = array<i64: 1, 8>}, {transform_indices = @transform_3, window_bounds = array<i64: 32, 16>}, {transform_indices = @transform_4, window_bounds = array<i64: 1, 8, 16>}, {transform_indices = @transform_5, window_bounds = array<i64: 1, 8, 16>}]} {
    %c0 = arith.constant 0 : index
    %c0_0 = arith.constant 0 : index
    %0 = vector.load %arg2[%c0, %c0_0] : memref<32x8xbf16, #tpu.memory_space<vmem>>, vector<32x8xbf16>
    %c0_1 = arith.constant 0 : index
    %c0_2 = arith.constant 0 : index
    %1 = vector.load %arg3[%c0_1, %c0_2] : memref<8x16xbf16, #tpu.memory_space<vmem>>, vector<8x16xbf16>
    %cst = arith.constant dense<0.000000e+00> : vector<32x16xf32>
    %2 = tpu.matmul %0, %1, %cst {dimension_numbers = #tpu.dot_dimension_numbers<[1], [0], [0], [1], [0, 0, 1, 1], [], []>} : vector<32x8xbf16>, vector<8x16xbf16>, vector<32x16xf32> -> vector<32x16xf32>
    %3 = arith.truncf %2 : vector<32x16xf32> to vector<32x16xbf16>
    %c0_3 = arith.constant 0 : index
    %c0_4 = arith.constant 0 : index
    %4 = vector.load %arg5[%c0_3, %c0_4] : memref<32x16xbf16, #tpu.memory_space<vmem>>, vector<32x16xbf16>
    tpu.vector_store %arg5[%c0_3, %c0_4], %3 {strides = array<i32>} : memref<32x16xbf16, #tpu.memory_space<vmem>>, vector<32x16xbf16>,
    %c0_i32 = arith.constant 0 : i32
    %5 = arith.cmpi eq, %arg1, %c0_i32 : i32
    %6 = arith.extui %5 : i1 to i32
    %c0_i32_5 = arith.constant 0 : i32
    %7 = arith.cmpi ne, %6, %c0_i32_5 : i32
    scf.if %7 {
      %cst_21 = arith.constant 0.000000e+00 : f32
      %33 = vector.broadcast %cst_21 : f32 to vector<1x8x16xf32>
      %c0_22 = arith.constant 0 : index
      %c0_23 = arith.constant 0 : index
      %c0_24 = arith.constant 0 : index
      %34 = vector.load %arg6[%c0_22, %c0_23, %c0_24] : memref<1x8x16xf32, #tpu.memory_space<vmem>>, vector<1x8x16xf32>
      tpu.vector_store %arg6[%c0_22, %c0_23, %c0_24], %33 {strides = array<i32>} : memref<1x8x16xf32, #tpu.memory_space<vmem>>, vector<1x8x16xf32>,
      %cst_25 = arith.constant 0.000000e+00 : f32
      %35 = vector.broadcast %cst_25 : f32 to vector<1x8x16xf32>
      %c0_26 = arith.constant 0 : index
      %c0_27 = arith.constant 0 : index
      %c0_28 = arith.constant 0 : index
      %36 = vector.load %arg7[%c0_26, %c0_27, %c0_28] : memref<1x8x16xf32, #tpu.memory_space<vmem>>, vector<1x8x16xf32>
      tpu.vector_store %arg7[%c0_26, %c0_27, %c0_28], %35 {strides = array<i32>} : memref<1x8x16xf32, #tpu.memory_space<vmem>>, vector<1x8x16xf32>,
    } else {
    }
    %c2_i32 = arith.constant 2 : i32
    %8 = arith.muli %arg0, %c2_i32 : i32
    %9 = arith.addi %8, %arg1 : i32
    %c32_i32 = arith.constant 32 : i32
    %10 = arith.muli %9, %c32_i32 : i32
    %11 = tpu.iota {dimensions = array<i32: 0>} : vector<32x16xi32>
    %12 = vector.broadcast %10 : i32 to vector<32x16xi32>
    %13 = arith.addi %11, %12 : vector<32x16xi32>
    %c96_i32 = arith.constant 96 : i32
    %14 = vector.broadcast %c96_i32 : i32 to vector<32x16xi32>
    %15 = arith.cmpi slt, %13, %14 : vector<32x16xi32>
    %cst_6 = arith.constant 0.000000e+00 : f32
    %16 = vector.broadcast %cst_6 : f32 to vector<32x16xf32>
    %17 = arith.select %15, %2, %16 : vector<32x16xi1>, vector<32x16xf32>
    %c0_7 = arith.constant 0 : index
    %c0_8 = arith.constant 0 : index
    %c0_9 = arith.constant 0 : index
    %18 = vector.load %arg6[%c0_7, %c0_8, %c0_9] : memref<1x8x16xf32, #tpu.memory_space<vmem>>, vector<1x8x16xf32>
    %cst_10 = arith.constant dense<0.000000e+00> : vector<16xf32>
    %19 = vector.multi_reduction <add>, %17, %cst_10 [0] : vector<32x16xf32> to vector<16xf32>
    %20 = vector.shape_cast %19 : vector<16xf32> to vector<1x16xf32>
    %21 = vector.shape_cast %20 : vector<1x16xf32> to vector<1x1x16xf32>
    %22 = vector.broadcast %21 : vector<1x1x16xf32> to vector<1x8x16xf32>
    %23 = arith.addf %18, %22 : vector<1x8x16xf32>
    %c0_11 = arith.constant 0 : index
    %c0_12 = arith.constant 0 : index
    %c0_13 = arith.constant 0 : index
    %24 = vector.load %arg6[%c0_11, %c0_12, %c0_13] : memref<1x8x16xf32, #tpu.memory_space<vmem>>, vector<1x8x16xf32>
    tpu.vector_store %arg6[%c0_11, %c0_12, %c0_13], %23 {strides = array<i32>} : memref<1x8x16xf32, #tpu.memory_space<vmem>>, vector<1x8x16xf32>,
    %c0_14 = arith.constant 0 : index
    %c0_15 = arith.constant 0 : index
    %c0_16 = arith.constant 0 : index
    %25 = vector.load %arg7[%c0_14, %c0_15, %c0_16] : memref<1x8x16xf32, #tpu.memory_space<vmem>>, vector<1x8x16xf32>
    %26 = arith.mulf %17, %17 : vector<32x16xf32>
    %cst_17 = arith.constant dense<0.000000e+00> : vector<16xf32>
    %27 = vector.multi_reduction <add>, %26, %cst_17 [0] : vector<32x16xf32> to vector<16xf32>
    %28 = vector.shape_cast %27 : vector<16xf32> to vector<1x16xf32>
    %29 = vector.shape_cast %28 : vector<1x16xf32> to vector<1x1x16xf32>
    %30 = vector.broadcast %29 : vector<1x1x16xf32> to vector<1x8x16xf32>
    %31 = arith.addf %25, %30 : vector<1x8x16xf32>
    %c0_18 = arith.constant 0 : index
    %c0_19 = arith.constant 0 : index
    %c0_20 = arith.constant 0 : index
    %32 = vector.load %arg7[%c0_18, %c0_19, %c0_20] : memref<1x8x16xf32, #tpu.memory_space<vmem>>, vector<1x8x16xf32>
    tpu.vector_store %arg7[%c0_18, %c0_19, %c0_20], %31 {strides = array<i32>} : memref<1x8x16xf32, #tpu.memory_space<vmem>>, vector<1x8x16xf32>,
    return
  }
  func.func @transform_0(%arg0: i32, %arg1: i32) -> (i32, i32) {
    %c2_i32 = arith.constant 2 : i32
    %0 = arith.muli %arg0, %c2_i32 : i32
    %1 = arith.addi %0, %arg1 : i32
    %c0_i32 = arith.constant 0 : i32
    %c0_i32_0 = arith.constant 0 : i32
    return %1, %c0_i32 : i32, i32
  }
  func.func @transform_1(%arg0: i32, %arg1: i32) -> (i32, i32) {
    %c0_i32 = arith.constant 0 : i32
    %c0_i32_0 = arith.constant 0 : i32
    %c0_i32_1 = arith.constant 0 : i32
    return %c0_i32, %c0_i32_0 : i32, i32
  }
  func.func @transform_2(%arg0: i32, %arg1: i32) -> (i32, i32) {
    %c0_i32 = arith.constant 0 : i32
    %c0_i32_0 = arith.constant 0 : i32
    %c0_i32_1 = arith.constant 0 : i32
    return %c0_i32, %c0_i32_0 : i32, i32
  }
  func.func @transform_3(%arg0: i32, %arg1: i32) -> (i32, i32) {
    %c2_i32 = arith.constant 2 : i32
    %0 = arith.muli %arg0, %c2_i32 : i32
    %1 = arith.addi %0, %arg1 : i32
    %c0_i32 = arith.constant 0 : i32
    %c0_i32_0 = arith.constant 0 : i32
    return %1, %c0_i32 : i32, i32
  }
  func.func @transform_4(%arg0: i32, %arg1: i32) -> (i32, i32, i32) {
    %c0_i32 = arith.constant 0 : i32
    %c0_i32_0 = arith.constant 0 : i32
    %c0_i32_1 = arith.constant 0 : i32
    return %arg0, %c0_i32, %c0_i32_0 : i32, i32, i32
  }
  func.func @transform_5(%arg0: i32, %arg1: i32) -> (i32, i32, i32) {
    %c0_i32 = arith.constant 0 : i32
    %c0_i32_0 = arith.constant 0 : i32
    %c0_i32_1 = arith.constant 0 : i32
    return %arg0, %c0_i32, %c0_i32_0 : i32, i32, i32
  }
}

</mosaic_0001>

<bundles_post_ra>
// kernel: tpu_custom_call.1
= control target key start
LH: loop header
LB: loop body
LE: loop exit
PB: predicated region body
PF: predicated region fallthrough
CT: control target
= control target key end

     0   :  { %11 = vsyncpa [#allocation3], 0  ;;  %s1107_s0 = inlined_call_operand.vmem [shape: bf16[128,8], index: 0, kind: input, shape index: {}]   ;;  %s1108_s1 = inlined_call_operand.vmem [shape: bf16[8,16], index: 1, kind: input, shape index: {}]   ;;  %s1109_s2 = inlined_call_operand.vmem [shape: f32[1,8], index: 2, kind: input, shape index: {}]   ;;  %s1110_s3 = inlined_call_operand.vmem [shape: bf16[128,16], index: 3, kind: output, shape index: {0}]   ;;  %s1111_s4 = inlined_call_operand.hbm [shape: f32[2,8,16], index: 4, kind: output, shape index: {1}]   ;;  %s1112_s5 = inlined_call_operand.hbm [shape: f32[2,8,16], index: 5, kind: output, shape index: {2}]  }
   0x1   :  { %13 = vsyncpa [#allocation3 + $0x1], 0 }
   0x2   :  { %14 = vsyncpa [#allocation5], 0 }
   0x3   :  { %16 = vsyncpa [#allocation5 + $0x1], 0  ;;  %s909_s18 = smov 0   ;;  %s911_s19 = smov 0  }
   0x4   :  { %s913_s20 = smov 0   ;;  %s915_s2 = smov 0  }
   0x5   :  { %s917_s21 = smov 0   ;;  %s919_s22 = smov 0  }
   0x6   :  { %s921_s23 = smov 0   ;;  %s923_s24 = smov 0  }
   0x7 LB: > { %s621_s25 = sadd.s32 4294967295, %s874_s24   ;;  %s622_s26 = sadd.s32 4294967294, %s874_s24   ;;  %s874_s24 = sphi %s923_s24, %s22_s24   ;;  %s870_s23 = sphi %s921_s23, %s1121_s23   ;;  %s866_s22 = sphi %s919_s22, %s1120_s22   ;;  %s862_s21 = sphi %s917_s21, %s1119_s21   ;;  %s858_s2 = sphi %s915_s2, %s1118_s2   ;;  %s854_s20 = sphi %s913_s20, %s1117_s20   ;;  %s850_s19 = sphi %s911_s19, %s1116_s19   ;;  %s846_s18 = sphi %s909_s18, %s1115_s18  }
   0x8   : > { %s31_s27 = sadd.s32 1, %s866_s22  ;;  %s34_s28 = sadd.s32 1, %s870_s23 }
   0x9   : > { %p32_p0 = scmp.ge.s32.totalorder %s31_s27, 2  ;;  %p153_p1 = scmp.ne.s32.totalorder %s854_s20, %s850_s19 }
   0xa   : > { %p154_p2 = scmp.eq.s32.totalorder %s621_s25, 3  ;;  %p159_p4 = scmp.ne.s32.totalorder %s850_s19, %s846_s18 }
   0xb   : > { %s1123_s27 = smov (%p32_p0, %s31_s27), 0  ;;  %s1125_s28 = smov (!%p32_p0, %s34_s28), %s870_s23 }
   0xc   : > { %p958_p3 = por %p154_p2, %p153_p1  ;;  %p36_p5 = scmp.ge.s32.totalorder %s1125_s28, 2 }
   0xd   : > { %p160_p6 = scmp.eq.s32.totalorder %s622_s26, 3  ;;  %p629_p7 = scmp.ge.s32.totalorder %s874_s24, 1 }
   0xe   : > { %p223_p8 = scmp.lt.s32.totalorder %s874_s24, 5  ;;  %s1127_s28 = smov (%p36_p5, %s1125_s28), 0 }
   0xf   : > { %p968_p9 = por %p160_p6, %p159_p4  ;;  %s140_s6 = ssub.s32 %s870_s23, %s1127_s28 }
  0x10   : > { %p224_p10 = pnand %p629_p7, %p223_p8  ;;  %s143_s7 = sadd.s32 1, %s854_s20 }
  0x11   : > { %p141_p11 = scmp.eq.s32.totalorder %s140_s6, 0  ;;  %s979_s9 = sand.u32 (!%p224_p10), 1, %s850_s19   ;;  %v290_v0 = vld [vmem:[%s1108_s1] sm:$0xf] (!%p224_p10)  ;;  %vm308_vm0 = vcmask (!%p224_p10), 1043456   ;;  %vm301_vm1 = vcmask (!%p224_p10), 64512  }
  0x12   : > { %227 = sbr.rel (%p224_p10) target bundleno = 316 (0x13c), region = 32  ;;  %s632_s12 = sshll.u32 (!%p224_p10), %s862_s21, 1  ;;  %668 = vmatprep.subr.msk.bf16.mxu0 (!%p224_p10), %vm308_vm0, %v290_v0  ;;  %v310_v1 = vsel (!%p224_p10), %vm308_vm0, %v290_v0, 0  ;;  %vm377_vm2 = vcmask (!%p224_p10), 125952  }
  0x13   : > { %s976_s8 = scalar_select %p141_p11, %s854_s20, %s143_s7  }
  0x14   : > { %s630_s13 = sshll.u32 (!%p224_p10), %s979_s9, 3  ;;  %s987_s14 = sadd.s32 (!%p224_p10), %s858_s2, %s632_s12  ;;  %663 = vmatpush3.bf16.msra.mxu0 (!%p224_p10), %v310_v1 }
  0x15   : > { %s633_s15 = sshll.u32 (!%p224_p10), %s987_s14, 2  ;;  %s996_s11 = scalar_lea.vmem (!%p224_p10), [#allocation2], %s630_s13 }
  0x16   : > { %p268_p12 = scmp.lt.s32.totalorder (!%p224_p10), %s633_s15, 15  ;;  %s998_s12 = scalar_lea.vmem (!%p224_p10), [#allocation4], %s630_s13 }
  0x17   : > { %p646_p13 = scmp.ne.s32.totalorder (!%p224_p10), %s858_s2, 0 }
  0x19   : > { %s1129_s15 = smov (!%p268_p12, %s633_s15), 15  ;;  %vm386_vm3 = vcmask (!%p646_p13), 130048   ;;  %v876_v12 = vmov (!%p646_p13), 0.0  }
  0x1a   : > { %s634_s16 = sshll.u32 %s1129_s15, 2  ;;  %387 = vst.msk [vmem:[%s996_s11] sm:$0xff] (!%p646_p13), %vm386_vm3, %v876_v12  ;;  %388 = vst.msk [vmem:[%s998_s12] sm:$0xff] (!%p646_p13), %vm386_vm3, %v876_v12 }
  0x1b   : > { %s271_s26 = scalar_lea.vmem %s1107_s0, %s634_s16  ;;  %s281_s10 = scalar_lea.vmem %s1110_s3, %s634_s16 }
  0x1c   : > { %v746_v2 = vld [vmem:[%s271_s26] sm:$0xff]   ;;  %v747_v3 = vld [vmem:[%s271_s26 + $0x8] sm:$0xff]  }
  0x1d   : > { %664 = vmatprep.mubr.msk.bf16.mxu0 %vm301_vm1, %v746_v2 }
  0x1e   : > { %665 = vmatmul.mubr.msk.bf16.vlgmr.msra.gmra.mrb[0].mxu0 %vm301_vm1, %v747_v3 }
  0xf1   : > { %v666_v4 = vpop.f32.mrb[0].mxu0  ;;  %385 = sbr.rel (%p646_p13) target bundleno = 248 (0xf8), region = 36 }
  0xf2   : > { %v657_v5 = vpack.c.bf16 %v666_v4, %v666_v4  ;;  %v346_v6 = vpop.f32.mrb[1].mxu0 }
  0xf3   : > { %v655_v7 = vpack.c.bf16 %v346_v6, %v346_v6  ;;  %v667_v8 = vpop.f32.mrb[2].mxu0 }
  0xf4   : > { %380 = vst.msk [vmem:[%s281_s10 + $0x8] sm:$0xf] %vm377_vm2, %v657_v5  ;;  %v658_v9 = vpack.c.bf16 %v667_v8, %v667_v8  ;;  %v349_v10 = vpop.f32.mrb[3].mxu0 }
  0xf5   : > { %378 = vst.msk [vmem:[%s281_s10] sm:$0xf] %vm377_vm2, %v655_v7  ;;  %v656_v11 = vpack.c.bf16 %v349_v10, %v349_v10 }
  0xf6   : > { %381 = vst.msk [vmem:[%s281_s10 + $0xc] sm:$0xf] %vm377_vm2, %v658_v9 }
  0xf7   : > { %379 = vst.msk [vmem:[%s281_s10 + $0x4] sm:$0xf] %vm377_vm2, %v656_v11 }
  0xf8 PF: > { %s648_s15 = sshll.u32 %s987_s14, 5  ;;  %v392_v13 = vlaneseq  ;;  %vm411_vm4 = vcmask 130048   ;;  %v410_v54 = vld [vmem:[%s996_s11] sm:$0xff]  ;;  %s651_s2 = sshll.u32 %s862_s21, 7  ;;  %v427_v57 = vld [vmem:[%s998_s12] sm:$0xff] }
  0xf9   : > { %v397_v14 = vstv %s648_s15  ;;  %s479_s13 = sshll.u32 %s996_s11, 4  ;;  %s492_s14 = sshll.u32 %s998_s12, 4  ;;  %s1022_s13 = int_to_ptr.vmem [resolvable:$true] %s479_s13  ;;  %s1031_s14 = int_to_ptr.vmem [resolvable:$true] %s492_s14 }
  0xfa   : > { %v393_v15 = vshrl.u32 %v392_v13, 7  ;;  %s1020_s25 = scalar_lea.hbm %s1111_s4, %s651_s2  ;;  %s1029_s6 = scalar_lea.hbm %s1112_s5, %s651_s2 }
  0xfb   : > { %s455_s7 = scalar_lea.sflag [#allocation3], %s979_s9  ;;  %s748_s10 = scalar_lea.vmem %s1022_s13, 128 }
  0xfc   : > { %v394_v16 = vadd.s32 8, %v393_v15  ;;  %v395_v17 = vadd.s32 16, %v393_v15  ;;  %v396_v18 = vadd.s32 24, %v393_v15  ;;  %v398_v19 = vadd.s32 %v397_v14, %v393_v15  ;;  %p749_p0 = scmp.ne.s32.totalorder %s1022_s13, %s748_s10  ;;  %s877_s15 = smov [#allocation2]  }
  0xfd   : > { %s752_s16 = sshll.u32 %s877_s15, 4  ;;  %s753_s16 = int_to_ptr.vmem [resolvable:$false] %s752_s16 }
  0xfe   : > { %v399_v20 = vadd.s32 %v397_v14, %v394_v16  ;;  %v400_v21 = vadd.s32 %v397_v14, %v395_v17  ;;  %v401_v22 = vadd.s32 %v397_v14, %v396_v18  ;;  %vm402_vm5 = vcmp.lt.s32.totalorder %v398_v19, 96  ;;  %p750_p1 = pnand %p749_p0, %p958_p3  ;;  %s754_s17 = scalar_lea.vmem %s753_s16, 256 }
  0xff   : > { %v406_v23 = vsel %vm402_vm5, %v346_v6, 0.0  ;;  %p755_p4 = scmp.lt.s32.totalorder %s1022_s13, %s753_s16  ;;  %p756_p5 = scmp.lt.s32.totalorder %s754_s17, %s748_s10 }
 0x100   : > { %vm403_vm6 = vcmp.lt.s32.totalorder %v399_v20, 96  ;;  %vm404_vm7 = vcmp.lt.s32.totalorder %v400_v21, 96  ;;  %vm405_vm8 = vcmp.lt.s32.totalorder %v401_v22, 96  ;;  %v412_v24 = vsel %vm411_vm4, %v406_v23, 0.0  ;;  %p751_p2 = pneg %p750_p1 }
 0x101   : > { %v407_v25 = vsel %vm403_vm6, %v349_v10, 0.0  ;;  %v408_v26 = vsel %vm404_vm7, %v666_v4, 0.0  ;;  %v409_v27 = vsel %vm405_vm8, %v667_v8, 0.0  ;;  %v428_v28 = vmul.f32 %v406_v23, %v406_v23  ;;  %p757_p6 = por %p756_p5, %p755_p4 }
 0x102   : > { %v413_v29 = vsel %vm411_vm4, %v407_v25, 0.0  ;;  %v415_v30 = vsel %vm411_vm4, %v408_v26, 0.0  ;;  %v429_v31 = vmul.f32 %v407_v25, %v407_v25  ;;  %v430_v33 = vmul.f32 %v408_v26, %v408_v26 }
 0x103   : > { %v414_v32 = vadd.f32 %v413_v29, %v412_v24  ;;  %v431_v34 = vmul.f32 %v409_v27, %v409_v27  ;;  %v432_v35 = vsel %vm411_vm4, %v428_v28, 0.0  ;;  %v417_v36 = vsel %vm411_vm4, %v409_v27, 0.0  ;;  %p758_p7 = pnand %p757_p6, %p751_p2 }
 0x104   : > { %v433_v37 = vsel %vm411_vm4, %v429_v31, 0.0  ;;  %v435_v40 = vsel %vm411_vm4, %v430_v33, 0.0 }
 0x105   : > { %v416_v38 = vadd.f32 %v415_v30, %v414_v32  ;;  %v434_v39 = vadd.f32 %v433_v37, %v432_v35  ;;  %v437_v41 = vsel %vm411_vm4, %v431_v34, 0.0 }
 0x107   : > { %v418_v42 = vadd.f32 %v417_v36, %v416_v38  ;;  %v436_v43 = vadd.f32 %v435_v40, %v434_v39 }
 0x109   : > { %v419_v44 = vrot.slane %v418_v42, 4  ;;  %v438_v45 = vadd.f32 %v437_v41, %v436_v43 }
 0x10b   : > { %v420_v46 = vadd.f32 %v419_v44, %v418_v42  ;;  %v439_v47 = vrot.slane %v438_v45, 4 }
 0x10d   : > { %v421_v48 = vrot.slane %v420_v46, 2  ;;  %v440_v49 = vadd.f32 %v439_v47, %v438_v45 }
 0x10f   : > { %v422_v50 = vadd.f32 %v421_v48, %v420_v46  ;;  %v441_v51 = vrot.slane %v440_v49, 2 }
 0x111   : > { %v423_v52 = vrot.slane %v422_v50, 1  ;;  %v442_v53 = vadd.f32 %v441_v51, %v440_v49 }
 0x113   : > { %v424_v55 = vadd.f32 %v423_v52, %v422_v50  ;;  %v443_v56 = vrot.slane %v442_v53, 1 }
 0x115   : > { %v425_v58 = vadd.f32 %v424_v55, %v410_v54  ;;  %v444_v59 = vadd.f32 %v443_v56, %v442_v53 }
 0x117   : > { %426 = vst.msk [vmem:[%s996_s11] sm:$0xff] %vm411_vm4, %v425_v58  ;;  %v445_v60 = vadd.f32 %v444_v59, %v427_v57 }
 0x118   : > { %761 = shalt.err (!%p758_p7)
}
 0x119   : > { %s762_s11 = scalar_lea.hbm %s1020_s25, 128  ;;  %s766_s26 = scalar_lea.hbm %s1111_s4, 256 }
 0x11a   : > { %p763_p8 = scmp.ne.s32.totalorder %s1020_s25, %s762_s11  ;;  %p767_p12 = scmp.lt.u32.totalorder %s1020_s25, %s1111_s4 }
 0x11b   : > { %p768_p13 = scmp.lt.u32.totalorder %s766_s26, %s762_s11  ;;  %p770_p1 = scmp.lt.u32.totalorder %s762_s11, %s1020_s25 }
 0x11c   : > { %p764_p10 = pnand %p763_p8, %p958_p3 }
 0x11d   : > { %p769_p0 = por %p768_p13, %p767_p12 }
 0x11e   : > { %p765_p11 = pneg %p764_p10 }
 0x11f   : > { %p771_p2 = por %p770_p1, %p769_p0 }
 0x121   : > { %p772_p4 = pnand %p771_p2, %p765_p11 }
 0x123   : > { %775 = shalt.err (!%p772_p4)
}
 0x124   : > { %669 = dma.vmem_to_hbm [thread:$0]  (%p958_p3), %s1022_s13, 128, %s1020_s25, %s455_s7   ;;  %446 = vst.msk [vmem:[%s998_s12] sm:$0xff] %vm411_vm4, %v445_v60 }
 0x125   : > { %s460_s10 = scalar_lea.sflag [#allocation5], %s979_s9  ;;  %s776_s17 = scalar_lea.vmem %s1031_s14, 128 }
 0x126   : > { %p777_p5 = scmp.ne.s32.totalorder %s1031_s14, %s776_s17  ;;  %s878_s11 = smov [#allocation4]  }
 0x127   : > { %s780_s2 = sshll.u32 %s878_s11, 4  ;;  %s781_s2 = int_to_ptr.vmem [resolvable:$false] %s780_s2 }
 0x128   : > { %p778_p6 = pnand %p777_p5, %p958_p3  ;;  %s782_s21 = scalar_lea.vmem %s781_s2, 256 }
 0x129   : > { %p783_p8 = scmp.lt.s32.totalorder %s1031_s14, %s781_s2  ;;  %p784_p10 = scmp.lt.s32.totalorder %s782_s21, %s776_s17 }
 0x12a   : > { %p779_p7 = pneg %p778_p6 }
 0x12b   : > { %p785_p11 = por %p784_p10, %p783_p8 }
 0x12d   : > { %p786_p12 = pnand %p785_p11, %p779_p7 }
 0x12f   : > { %789 = shalt.err (!%p786_p12)
}
 0x130   : > { %s790_s9 = scalar_lea.hbm %s1029_s6, 128  ;;  %s794_s25 = scalar_lea.hbm %s1112_s5, 256 }
 0x131   : > { %p791_p13 = scmp.ne.s32.totalorder %s1029_s6, %s790_s9  ;;  %p795_p2 = scmp.lt.u32.totalorder %s1029_s6, %s1112_s5 }
 0x132   : > { %p796_p4 = scmp.lt.u32.totalorder %s794_s25, %s790_s9  ;;  %p798_p6 = scmp.lt.u32.totalorder %s790_s9, %s1029_s6 }
 0x133   : > { %p792_p0 = pnand %p791_p13, %p958_p3 }
 0x134   : > { %p797_p5 = por %p796_p4, %p795_p2 }
 0x135   : > { %p793_p1 = pneg %p792_p0 }
 0x136   : > { %p799_p7 = por %p798_p6, %p797_p5 }
 0x138   : > { %p800_p8 = pnand %p799_p7, %p793_p1 }
 0x13a   : > { %803 = shalt.err (!%p800_p8)
}
 0x13b   : > { %670 = dma.vmem_to_hbm [thread:$0]  (%p958_p3), %s1031_s14, 128, %s1029_s6, %s460_s10  }
 0x13c PF: > { %p680_p10 = scmp.ge.s32.totalorder %s874_s24, 2  ;;  %s514_s15 = sand.u32 1, %s846_s18  }
 0x13d   : > { %s515_s16 = scalar_lea.sflag [#allocation3], %s514_s15 }
 0x13e   : > { %p674_p11 = pnand %p680_p10, %p968_p9 }
 0x140   : > { %837 = dma.done.wait (!%p674_p11), %s515_s16, 128  }
 0x141   : > { %839 = vsyncadd (!%p674_p11), %s515_s16, 4294967168  ;;  %s524_s17 = scalar_lea.sflag [#allocation5], %s514_s15 }
 0x142   : > { %841 = dma.done.wait (!%p674_p11), %s524_s17, 128  }
 0x143   : > { %843 = vsyncadd (!%p674_p11), %s524_s17, 4294967168  ;;  %s22_s24 = sadd.s32 1, %s874_s24   ;;  %s1115_s18 = smov %s850_s19 }
 0x144   : > { %p19_p12 = scmp.ge.s32.totalorder %s22_s24, 6   ;;  %s1116_s19 = smov %s854_s20 }
 0x145   : > { %s1117_s20 = smov %s976_s8  ;;  %s1118_s2 = smov %s866_s22 }
 0x146   : > { %s1119_s21 = smov %s870_s23  ;;  %s1120_s22 = smov %s1123_s27 }
 0x147   : > { %s1121_s23 = smov %s1127_s28  ;;  %21 = sbr.rel (!%p19_p12) target bundleno = 7 (0x7), region = 100 }
 0x14e   :  { %529 = vsyncpa [#allocation3], 1 }
 0x14f   :  { %531 = vsyncpa [#allocation3 + $0x1], 1 }
 0x150   :  { %532 = vsyncpa [#allocation5], 1 }
 0x151   :  { %534 = vsyncpa [#allocation5 + $0x1], 1 }

</bundles_post_ra>
